<compile_context>
chip_gen: v5e
topology: v5e:2x2
jax: 0.10.0
libtpu: 0.0.40
codegen_flags: <defaults>
</compile_context>

<pallas_src>
import jax
import jax.numpy as jnp
from jax.experimental import pallas as pl
from jax.experimental.pallas import tpu as pltpu

EPS = 1e-5
LANE = 128


def _round_up(x, m):
    return (x + m - 1) // m * m


# ----------------------------------------------------------------------------
# Kernels
# ----------------------------------------------------------------------------
def _conv3_taps_dot(v, m_ref, w_ref):
    """Fused pad-1 3-tap conv as three accumulated MXU dots (no tap concat).

    v:      (R, C_in) f32 tile of whole sequences (channels-last rows).
    m_ref:  (R, 2) f32 boundary masks [prev_ok, next_ok] (zero at l==0 / l==L-1).
    w_ref:  (3, C_in, C_out_pad) bf16 per-tap weights.
    Returns (R, C_out_pad) f32 accumulator.
    """
    R = v.shape[0]
    m = m_ref[...]
    vp = (pltpu.roll(v, 1, 0) * m[:, 0:1]).astype(jnp.bfloat16)      # x[l-1]
    vc = v.astype(jnp.bfloat16)                                      # x[l]
    vn = (pltpu.roll(v, R - 1, 0) * m[:, 1:2]).astype(jnp.bfloat16)  # x[l+1]
    acc = jnp.dot(vp, w_ref[0], preferred_element_type=jnp.float32)
    acc += jnp.dot(vc, w_ref[1], preferred_element_type=jnp.float32)
    acc += jnp.dot(vn, w_ref[2], preferred_element_type=jnp.float32)
    return acc


def _conv1_stats_kernel(x_ref, m_ref, w_ref, h_ref, st_ref):
    # x_ref: (R, Cin) f32 (unpadded), h_ref: (R, Cpo) bf16, st_ref: (1, 2, Cpo) f32
    h = _conv3_taps_dot(x_ref[...], m_ref, w_ref)
    h_ref[...] = h.astype(h_ref.dtype)
    s = jnp.sum(h, axis=0, keepdims=True)
    ss = jnp.sum(h * h, axis=0, keepdims=True)
    st_ref[...] = jnp.concatenate([s, ss], axis=0).reshape(st_ref.shape)


def _bn_conv2_stats_kernel(h_ref, m_ref, sc_ref, sh_ref, w_ref, y_ref, st_ref):
    # BN1 (folded scale/shift) + ReLU in f32, then fused 3-tap conv2 in bf16.
    a = jnp.maximum(h_ref[...].astype(jnp.float32) * sc_ref[...] + sh_ref[...], 0.0)
    y = _conv3_taps_dot(a, m_ref, w_ref)
    y_ref[...] = y.astype(y_ref.dtype)
    s = jnp.sum(y, axis=0, keepdims=True)
    ss = jnp.sum(y * y, axis=0, keepdims=True)
    st_ref[...] = jnp.concatenate([s, ss], axis=0).reshape(st_ref.shape)


def _bn_relu_kernel(y_ref, sc_ref, sh_ref, o_ref):
    o_ref[...] = jnp.maximum(
        y_ref[...].astype(jnp.float32) * sc_ref[...] + sh_ref[...], 0.0
    ).astype(o_ref.dtype)


# ----------------------------------------------------------------------------
# Wrapper helpers
# ----------------------------------------------------------------------------
def _vmem_limit_bytes():
    """Scoped-VMEM limit from hardware info (0.75 * per-core capacity, <=100MiB)."""
    try:
        cap = int(pltpu.get_tpu_info().vmem_capacity_bytes)
    except Exception:
        cap = 64 * 1024 * 1024  # conservative fallback (v7x per-TensorCore)
    return int(max(32 << 20, min((cap * 3) // 4, 100 << 20)))


def _choose_seqs_per_tile(N, L, row_bytes, budget_bytes):
    """Largest whole-sequence row tile fitting the VMEM budget.

    Tiles cover whole sequences (pad-1 boundaries stay intra-tile) and keep the
    sublane dim a multiple of 16 (bf16-safe) unless they span the full row dim.
    Keeps grid size G = N/TB >= 2 when N allows (both v7x TensorCores busy).
    """
    valid = [tb for tb in range(1, N + 1)
             if N % tb == 0 and ((tb * L) % 16 == 0 or tb == N)]
    multi = [tb for tb in valid if N // tb >= 2]
    if multi:
        valid = multi
    fitting = [tb for tb in valid if tb * L * row_bytes <= budget_bytes]
    # TODO(synk): sub-sequence tiling with a 1-row halo for very long L where a
    # single sequence exceeds the VMEM budget (fallback below may overshoot).
    return max(fitting) if fitting else min(valid)


def _finalize_bn(partial_stats, gamma, beta, count):
    """Per-tile partial (sum, sumsq) -> folded BN scale/shift (f32, biased var)."""
    # TODO(synk): Welford / mean-shifted combination if E[x^2]-E[x]^2 cancellation
    # ever matters for very large N*L.
    s = jnp.sum(partial_stats, axis=0)                    # (2, Cpo)
    mean = s[0] / count
    var = jnp.maximum(s[1] / count - mean * mean, 0.0)    # biased (training mode)
    scale = gamma * jax.lax.rsqrt(var + EPS)
    shift = beta - mean * scale
    return scale.reshape(1, -1), shift.reshape(1, -1)


# ----------------------------------------------------------------------------
# Forward
# ----------------------------------------------------------------------------
def double_conv_block(x, params):
    """x: (N, C_in, L) float32 (PyTorch NCL). Returns (N, C_out, L) float32."""
    w1, b1, g1, be1, w2, b2, g2, be2 = params
    del b1, b2  # conv bias is exactly cancelled by training-mode BatchNorm
    N, Cin, L = x.shape
    Cout = w1.shape[0]
    Cpo = _round_up(Cout, LANE)
    NL = N * L

    # Channels-last rows; input channels left UNPADDED (full-dim block is legal).
    x_rows = jnp.transpose(x, (0, 2, 1)).reshape(NL, Cin).astype(jnp.float32)

    # torch (C_out, C_in, 3) -> per-tap (3, C_in[_pad], C_out_pad) bf16.
    w1k = jnp.transpose(w1, (2, 1, 0))                                 # (3, Cin, Cout)
    w1k = jnp.pad(w1k, ((0, 0), (0, 0), (0, Cpo - Cout))).astype(jnp.bfloat16)
    w2k = jnp.transpose(w2, (2, 1, 0))                                 # (3, Cout, Cout)
    w2k = jnp.pad(w2k, ((0, 0), (0, Cpo - Cout), (0, Cpo - Cout))).astype(jnp.bfloat16)

    # Pad gamma/beta with zeros -> padded lanes are forced to exactly zero.
    pad_c = lambda v: jnp.pad(v, (0, Cpo - Cout))
    g1p, be1p = pad_c(g1), pad_c(be1)
    g2p, be2p = pad_c(g2), pad_c(be2)

    # VMEM accounting: scoped limit from HW info; subtract double-buffered bf16
    # weights + headroom, then solve for the row tile from a per-row live estimate
    # (dominant pass 2: bf16 in/out double-buffers + f32 temporaries).
    vmem_limit = _vmem_limit_bytes()
    w_bytes = 2 * 3 * max(Cin, Cpo) * Cpo * 2
    row_bytes = 24 * Cpo + 20 * Cin
    budget = max(vmem_limit - w_bytes - (2 << 20), 1 << 20)
    TB = _choose_seqs_per_tile(N, L, row_bytes, budget)
    R = TB * L
    G = NL // R

    # Pad-1 conv boundary masks (identical for every tile of whole sequences).
    l_idx = jnp.arange(R) % L
    mask = jnp.stack([(l_idx != 0), (l_idx != L - 1)], axis=1).astype(jnp.float32)

    cparams = pltpu.CompilerParams(
        dimension_semantics=("parallel",),
        vmem_limit_bytes=vmem_limit,
    )

    row_spec_x = pl.BlockSpec((R, Cin), lambda i: (i, 0))
    row_spec_h = pl.BlockSpec((R, Cpo), lambda i: (i, 0))   # bf16 activations
    row_spec_o = pl.BlockSpec((R, Cpo), lambda i: (i, 0))   # f32 final output
    mask_spec = pl.BlockSpec((R, 2), lambda i: (0, 0))
    w1_spec = pl.BlockSpec((3, Cin, Cpo), lambda i: (0, 0, 0))
    w2_spec = pl.BlockSpec((3, Cpo, Cpo), lambda i: (0, 0, 0))
    vec_spec = pl.BlockSpec((1, Cpo), lambda i: (0, 0))
    stat_spec = pl.BlockSpec((1, 2, Cpo), lambda i: (i, 0, 0))

    act_bf16 = jax.ShapeDtypeStruct((NL, Cpo), jnp.bfloat16)
    act_f32 = jax.ShapeDtypeStruct((NL, Cpo), jnp.float32)
    stat_shape = jax.ShapeDtypeStruct((G, 2, Cpo), jnp.float32)

    # Pass 1: conv1 (3 accumulated MXU dots) + per-tile BN1 partial sums.
    h1, st1 = pl.pallas_call(
        _conv1_stats_kernel,
        grid=(G,),
        in_specs=[row_spec_x, mask_spec, w1_spec],
        out_specs=[row_spec_h, stat_spec],
        out_shape=[act_bf16, stat_shape],
        compiler_params=cparams,
    )(x_rows, mask, w1k)

    sc1, sh1 = _finalize_bn(st1, g1p, be1p, NL)

    # Pass 2: BN1 + ReLU + conv2 (fused) + per-tile BN2 partial sums.
    h2, st2 = pl.pallas_call(
        _bn_conv2_stats_kernel,
        grid=(G,),
        in_specs=[row_spec_h, mask_spec, vec_spec, vec_spec, w2_spec],
        out_specs=[row_spec_h, stat_spec],
        out_shape=[act_bf16, stat_shape],
        compiler_params=cparams,
    )(h1, mask, sc1, sh1, w2k)

    sc2, sh2 = _finalize_bn(st2, g2p, be2p, NL)

    # Pass 3: BN2 + ReLU (f32 output).
    out_rows = pl.pallas_call(
        _bn_relu_kernel,
        grid=(G,),
        in_specs=[row_spec_h, vec_spec, vec_spec],
        out_specs=row_spec_o,
        out_shape=act_f32,
        compiler_params=cparams,
    )(h2, sc2, sh2)

    out = out_rows[:, :Cout].reshape(N, L, Cout)
    return jnp.transpose(out, (0, 2, 1))


# ----------------------------------------------------------------------------
# Pure-JAX reference (matches the PyTorch training-mode forward, with bias)
# ----------------------------------------------------------------------------
def double_conv_block_ref(x, params):
    w1, b1, g1, be1, w2, b2, g2, be2 = params

    def conv1d(v, w, b):
        y = jax.lax.conv_general_dilated(
            v, w, window_strides=(1,), padding=[(1, 1)],
            dimension_numbers=('NCH', 'OIH', 'NCH'))
        return y + b[None, :, None]

    def bn_relu(y, g, be):
        mean = jnp.mean(y, axis=(0, 2), keepdims=True)
        var = jnp.mean((y - mean) ** 2, axis=(0, 2), keepdims=True)
        yn = (y - mean) * jax.lax.rsqrt(var + EPS)
        return jnp.maximum(yn * g[None, :, None] + be[None, :, None], 0.0)

    h = bn_relu(conv1d(x, w1, b1), g1, be1)
    return bn_relu(conv1d(h, w2, b2), g2, be2)


def init_params(key, in_channels, out_channels, kernel_size=3):
    k1, k2, k3, k4 = jax.random.split(key, 4)
    s1 = 1.0 / (in_channels * kernel_size) ** 0.5
    s2 = 1.0 / (out_channels * kernel_size) ** 0.5
    w1 = jax.random.uniform(k1, (out_channels, in_channels, kernel_size),
                            jnp.float32, -s1, s1)
    b1 = jax.random.uniform(k2, (out_channels,), jnp.float32, -s1, s1)
    w2 = jax.random.uniform(k3, (out_channels, out_channels, kernel_size),
                            jnp.float32, -s2, s2)
    b2 = jax.random.uniform(k4, (out_channels,), jnp.float32, -s2, s2)
    g1 = jnp.ones((out_channels,), jnp.float32)    # BatchNorm gamma init
    be1 = jnp.zeros((out_channels,), jnp.float32)  # BatchNorm beta init
    g2 = jnp.ones((out_channels,), jnp.float32)
    be2 = jnp.zeros((out_channels,), jnp.float32)
    return (w1, b1, g1, be1, w2, b2, g2, be2)


if __name__ == "__main__":
    key = jax.random.PRNGKey(0)
    kx, kp = jax.random.split(key)

    N, Cin, Cout, L = 2, 4, 8, 16
    x = jax.random.normal(kx, (N, Cin, L), jnp.float32)
    params = init_params(kp, Cin, Cout)

    fwd = jax.jit(double_conv_block)
    out = jax.block_until_ready(fwd(x, params))

    ref = double_conv_block_ref(x, params)
    assert out.shape == (N, Cout, L)
    # bf16 MXU inputs + bf16 inter-pass activations (f32 accumulation / BN math)
    # -> compare against the f32 reference with bf16-appropriate tolerance.
    max_err = float(jnp.max(jnp.abs(out - ref)))
    assert jnp.allclose(out, ref, atol=5e-2, rtol=5e-2), max_err

    print("KERNEL_OK")
</pallas_src>

<mosaic_0001>
module attributes {stable_mosaic.version = 11 : i64} {
  func.func @_conv1_stats_kernel(%arg0: i32, %arg1: memref<16x4xf32, #tpu.memory_space<vmem>>, %arg2: memref<16x2xf32, #tpu.memory_space<vmem>>, %arg3: memref<3x4x128xbf16, #tpu.memory_space<vmem>>, %arg4: memref<16x128xbf16, #tpu.memory_space<vmem>>, %arg5: memref<1x2x128xf32, #tpu.memory_space<vmem>>) attributes {dimension_semantics = [#tpu.dimension_semantics<parallel>], iteration_bounds = array<i64: 2>, scalar_prefetch = 0 : i64, scratch_operands = 0 : i64, tpu.core_type = #tpu.core_type<tc>, window_params = [{transform_indices = @transform_0, window_bounds = array<i64: 16, 4>}, {pipeline_mode = #tpu.pipeline_mode<synchronous>, transform_indices = @transform_1, window_bounds = array<i64: 16, 2>}, {pipeline_mode = #tpu.pipeline_mode<synchronous>, transform_indices = @transform_2, window_bounds = array<i64: 3, 4, 128>}, {transform_indices = @transform_3, window_bounds = array<i64: 16, 128>}, {transform_indices = @transform_4, window_bounds = array<i64: 1, 2, 128>}]} {
    %c0 = arith.constant 0 : index
    %c0_0 = arith.constant 0 : index
    %0 = vector.load %arg1[%c0, %c0_0] : memref<16x4xf32, #tpu.memory_space<vmem>>, vector<16x4xf32>
    %c0_1 = arith.constant 0 : index
    %c0_2 = arith.constant 0 : index
    %1 = vector.load %arg2[%c0_1, %c0_2] : memref<16x2xf32, #tpu.memory_space<vmem>>, vector<16x2xf32>
    %c1_i32 = arith.constant 1 : i32
    %2 = tpu.dynamic_rotate %0 by %c1_i32 dim 0 : vector<16x4xf32>, i32 -> vector<16x4xf32>
    %3 = vector.extract_strided_slice %1 {offsets = [0, 0], sizes = [16, 1], strides = [1, 1]} : vector<16x2xf32> to vector<16x1xf32>
    %4 = vector.broadcast %3 : vector<16x1xf32> to vector<16x4xf32>
    %5 = arith.mulf %2, %4 : vector<16x4xf32>
    %6 = arith.truncf %5 : vector<16x4xf32> to vector<16x4xbf16>
    %7 = arith.truncf %0 : vector<16x4xf32> to vector<16x4xbf16>
    %c15_i32 = arith.constant 15 : i32
    %8 = tpu.dynamic_rotate %0 by %c15_i32 dim 0 : vector<16x4xf32>, i32 -> vector<16x4xf32>
    %9 = vector.extract_strided_slice %1 {offsets = [0, 1], sizes = [16, 1], strides = [1, 1]} : vector<16x2xf32> to vector<16x1xf32>
    %10 = vector.broadcast %9 : vector<16x1xf32> to vector<16x4xf32>
    %11 = arith.mulf %8, %10 : vector<16x4xf32>
    %12 = arith.truncf %11 : vector<16x4xf32> to vector<16x4xbf16>
    %c0_3 = arith.constant 0 : index
    %c0_4 = arith.constant 0 : index
    %c0_5 = arith.constant 0 : index
    %13 = vector.load %arg3[%c0_3, %c0_4, %c0_5] : memref<3x4x128xbf16, #tpu.memory_space<vmem>>, vector<1x4x128xbf16>
    %14 = vector.shape_cast %13 : vector<1x4x128xbf16> to vector<4x128xbf16>
    %cst = arith.constant dense<0.000000e+00> : vector<16x128xf32>
    %15 = tpu.matmul %6, %14, %cst {dimension_numbers = #tpu.dot_dimension_numbers<[1], [0], [0], [1], [0, 0, 1, 1], [], []>} : vector<16x4xbf16>, vector<4x128xbf16>, vector<16x128xf32> -> vector<16x128xf32>
    %c1 = arith.constant 1 : index
    %c0_6 = arith.constant 0 : index
    %c0_7 = arith.constant 0 : index
    %16 = vector.load %arg3[%c1, %c0_6, %c0_7] : memref<3x4x128xbf16, #tpu.memory_space<vmem>>, vector<1x4x128xbf16>
    %17 = vector.shape_cast %16 : vector<1x4x128xbf16> to vector<4x128xbf16>
    %cst_8 = arith.constant dense<0.000000e+00> : vector<16x128xf32>
    %18 = tpu.matmul %7, %17, %cst_8 {dimension_numbers = #tpu.dot_dimension_numbers<[1], [0], [0], [1], [0, 0, 1, 1], [], []>} : vector<16x4xbf16>, vector<4x128xbf16>, vector<16x128xf32> -> vector<16x128xf32>
    %19 = arith.addf %15, %18 : vector<16x128xf32>
    %c2 = arith.constant 2 : index
    %c0_9 = arith.constant 0 : index
    %c0_10 = arith.constant 0 : index
    %20 = vector.load %arg3[%c2, %c0_9, %c0_10] : memref<3x4x128xbf16, #tpu.memory_space<vmem>>, vector<1x4x128xbf16>
    %21 = vector.shape_cast %20 : vector<1x4x128xbf16> to vector<4x128xbf16>
    %cst_11 = arith.constant dense<0.000000e+00> : vector<16x128xf32>
    %22 = tpu.matmul %12, %21, %cst_11 {dimension_numbers = #tpu.dot_dimension_numbers<[1], [0], [0], [1], [0, 0, 1, 1], [], []>} : vector<16x4xbf16>, vector<4x128xbf16>, vector<16x128xf32> -> vector<16x128xf32>
    %23 = arith.addf %19, %22 : vector<16x128xf32>
    %24 = arith.truncf %23 : vector<16x128xf32> to vector<16x128xbf16>
    %c0_12 = arith.constant 0 : index
    %c0_13 = arith.constant 0 : index
    %25 = vector.load %arg4[%c0_12, %c0_13] : memref<16x128xbf16, #tpu.memory_space<vmem>>, vector<16x128xbf16>
    tpu.vector_store %arg4[%c0_12, %c0_13], %24 {strides = array<i32>} : memref<16x128xbf16, #tpu.memory_space<vmem>>, vector<16x128xbf16>,
    %cst_14 = arith.constant dense<0.000000e+00> : vector<128xf32>
    %26 = vector.multi_reduction <add>, %23, %cst_14 [0] : vector<16x128xf32> to vector<128xf32>
    %27 = vector.shape_cast %26 : vector<128xf32> to vector<1x128xf32>
    %28 = arith.mulf %23, %23 : vector<16x128xf32>
    %cst_15 = arith.constant dense<0.000000e+00> : vector<128xf32>
    %29 = vector.multi_reduction <add>, %28, %cst_15 [0] : vector<16x128xf32> to vector<128xf32>
    %30 = vector.shape_cast %29 : vector<128xf32> to vector<1x128xf32>
    %31 = tpu.concatenate %27, %30 in 0 : vector<1x128xf32>, vector<1x128xf32> -> vector<2x128xf32>
    %32 = vector.shape_cast %31 : vector<2x128xf32> to vector<1x2x128xf32>
    %c0_16 = arith.constant 0 : index
    %c0_17 = arith.constant 0 : index
    %c0_18 = arith.constant 0 : index
    %33 = vector.load %arg5[%c0_16, %c0_17, %c0_18] : memref<1x2x128xf32, #tpu.memory_space<vmem>>, vector<1x2x128xf32>
    tpu.vector_store %arg5[%c0_16, %c0_17, %c0_18], %32 {strides = array<i32>} : memref<1x2x128xf32, #tpu.memory_space<vmem>>, vector<1x2x128xf32>,
    return
  }
  func.func @transform_0(%arg0: i32) -> (i32, i32) {
    %c0_i32 = arith.constant 0 : i32
    %c0_i32_0 = arith.constant 0 : i32
    return %arg0, %c0_i32 : i32, i32
  }
  func.func @transform_1(%arg0: i32) -> (i32, i32) {
    %c0_i32 = arith.constant 0 : i32
    %c0_i32_0 = arith.constant 0 : i32
    %c0_i32_1 = arith.constant 0 : i32
    return %c0_i32, %c0_i32_0 : i32, i32
  }
  func.func @transform_2(%arg0: i32) -> (i32, i32, i32) {
    %c0_i32 = arith.constant 0 : i32
    %c0_i32_0 = arith.constant 0 : i32
    %c0_i32_1 = arith.constant 0 : i32
    %c0_i32_2 = arith.constant 0 : i32
    return %c0_i32, %c0_i32_0, %c0_i32_1 : i32, i32, i32
  }
  func.func @transform_3(%arg0: i32) -> (i32, i32) {
    %c0_i32 = arith.constant 0 : i32
    %c0_i32_0 = arith.constant 0 : i32
    return %arg0, %c0_i32 : i32, i32
  }
  func.func @transform_4(%arg0: i32) -> (i32, i32, i32) {
    %c0_i32 = arith.constant 0 : i32
    %c0_i32_0 = arith.constant 0 : i32
    %c0_i32_1 = arith.constant 0 : i32
    return %arg0, %c0_i32, %c0_i32_0 : i32, i32, i32
  }
}

module attributes {stable_mosaic.version = 11 : i64} {
  func.func @_bn_conv2_stats_kernel(%arg0: i32, %arg1: memref<16x128xbf16, #tpu.memory_space<vmem>>, %arg2: memref<16x2xf32, #tpu.memory_space<vmem>>, %arg3: memref<1x128xf32, #tpu.memory_space<vmem>>, %arg4: memref<1x128xf32, #tpu.memory_space<vmem>>, %arg5: memref<3x128x128xbf16, #tpu.memory_space<vmem>>, %arg6: memref<16x128xbf16, #tpu.memory_space<vmem>>, %arg7: memref<1x2x128xf32, #tpu.memory_space<vmem>>) attributes {dimension_semantics = [#tpu.dimension_semantics<parallel>], iteration_bounds = array<i64: 2>, scalar_prefetch = 0 : i64, scratch_operands = 0 : i64, tpu.core_type = #tpu.core_type<tc>, window_params = [{transform_indices = @transform_0, window_bounds = array<i64: 16, 128>}, {pipeline_mode = #tpu.pipeline_mode<synchronous>, transform_indices = @transform_1, window_bounds = array<i64: 16, 2>}, {pipeline_mode = #tpu.pipeline_mode<synchronous>, transform_indices = @transform_2, window_bounds = array<i64: 1, 128>}, {pipeline_mode = #tpu.pipeline_mode<synchronous>, transform_indices = @transform_3, window_bounds = array<i64: 1, 128>}, {pipeline_mode = #tpu.pipeline_mode<synchronous>, transform_indices = @transform_4, window_bounds = array<i64: 3, 128, 128>}, {transform_indices = @transform_5, window_bounds = array<i64: 16, 128>}, {transform_indices = @transform_6, window_bounds = array<i64: 1, 2, 128>}]} {
    %c0 = arith.constant 0 : index
    %c0_0 = arith.constant 0 : index
    %0 = vector.load %arg1[%c0, %c0_0] : memref<16x128xbf16, #tpu.memory_space<vmem>>, vector<16x128xbf16>
    %1 = arith.extf %0 : vector<16x128xbf16> to vector<16x128xf32>
    %c0_1 = arith.constant 0 : index
    %c0_2 = arith.constant 0 : index
    %2 = vector.load %arg3[%c0_1, %c0_2] : memref<1x128xf32, #tpu.memory_space<vmem>>, vector<1x128xf32>
    %3 = vector.broadcast %2 : vector<1x128xf32> to vector<16x128xf32>
    %4 = arith.mulf %1, %3 : vector<16x128xf32>
    %c0_3 = arith.constant 0 : index
    %c0_4 = arith.constant 0 : index
    %5 = vector.load %arg4[%c0_3, %c0_4] : memref<1x128xf32, #tpu.memory_space<vmem>>, vector<1x128xf32>
    %6 = vector.broadcast %5 : vector<1x128xf32> to vector<16x128xf32>
    %7 = arith.addf %4, %6 : vector<16x128xf32>
    %cst = arith.constant 0.000000e+00 : f32
    %8 = vector.broadcast %cst : f32 to vector<16x128xf32>
    %9 = arith.maximumf %7, %8 : vector<16x128xf32>
    %c0_5 = arith.constant 0 : index
    %c0_6 = arith.constant 0 : index
    %10 = vector.load %arg2[%c0_5, %c0_6] : memref<16x2xf32, #tpu.memory_space<vmem>>, vector<16x2xf32>
    %c1_i32 = arith.constant 1 : i32
    %11 = tpu.dynamic_rotate %9 by %c1_i32 dim 0 : vector<16x128xf32>, i32 -> vector<16x128xf32>
    %12 = vector.extract_strided_slice %10 {offsets = [0, 0], sizes = [16, 1], strides = [1, 1]} : vector<16x2xf32> to vector<16x1xf32>
    %13 = vector.broadcast %12 : vector<16x1xf32> to vector<16x128xf32>
    %14 = arith.mulf %11, %13 : vector<16x128xf32>
    %15 = arith.truncf %14 : vector<16x128xf32> to vector<16x128xbf16>
    %16 = arith.truncf %9 : vector<16x128xf32> to vector<16x128xbf16>
    %c15_i32 = arith.constant 15 : i32
    %17 = tpu.dynamic_rotate %9 by %c15_i32 dim 0 : vector<16x128xf32>, i32 -> vector<16x128xf32>
    %18 = vector.extract_strided_slice %10 {offsets = [0, 1], sizes = [16, 1], strides = [1, 1]} : vector<16x2xf32> to vector<16x1xf32>
    %19 = vector.broadcast %18 : vector<16x1xf32> to vector<16x128xf32>
    %20 = arith.mulf %17, %19 : vector<16x128xf32>
    %21 = arith.truncf %20 : vector<16x128xf32> to vector<16x128xbf16>
    %c0_7 = arith.constant 0 : index
    %c0_8 = arith.constant 0 : index
    %c0_9 = arith.constant 0 : index
    %22 = vector.load %arg5[%c0_7, %c0_8, %c0_9] : memref<3x128x128xbf16, #tpu.memory_space<vmem>>, vector<1x128x128xbf16>
    %23 = vector.shape_cast %22 : vector<1x128x128xbf16> to vector<128x128xbf16>
    %cst_10 = arith.constant dense<0.000000e+00> : vector<16x128xf32>
    %24 = tpu.matmul %15, %23, %cst_10 {dimension_numbers = #tpu.dot_dimension_numbers<[1], [0], [0], [1], [0, 0, 1, 1], [], []>} : vector<16x128xbf16>, vector<128x128xbf16>, vector<16x128xf32> -> vector<16x128xf32>
    %c1 = arith.constant 1 : index
    %c0_11 = arith.constant 0 : index
    %c0_12 = arith.constant 0 : index
    %25 = vector.load %arg5[%c1, %c0_11, %c0_12] : memref<3x128x128xbf16, #tpu.memory_space<vmem>>, vector<1x128x128xbf16>
    %26 = vector.shape_cast %25 : vector<1x128x128xbf16> to vector<128x128xbf16>
    %cst_13 = arith.constant dense<0.000000e+00> : vector<16x128xf32>
    %27 = tpu.matmul %16, %26, %cst_13 {dimension_numbers = #tpu.dot_dimension_numbers<[1], [0], [0], [1], [0, 0, 1, 1], [], []>} : vector<16x128xbf16>, vector<128x128xbf16>, vector<16x128xf32> -> vector<16x128xf32>
    %28 = arith.addf %24, %27 : vector<16x128xf32>
    %c2 = arith.constant 2 : index
    %c0_14 = arith.constant 0 : index
    %c0_15 = arith.constant 0 : index
    %29 = vector.load %arg5[%c2, %c0_14, %c0_15] : memref<3x128x128xbf16, #tpu.memory_space<vmem>>, vector<1x128x128xbf16>
    %30 = vector.shape_cast %29 : vector<1x128x128xbf16> to vector<128x128xbf16>
    %cst_16 = arith.constant dense<0.000000e+00> : vector<16x128xf32>
    %31 = tpu.matmul %21, %30, %cst_16 {dimension_numbers = #tpu.dot_dimension_numbers<[1], [0], [0], [1], [0, 0, 1, 1], [], []>} : vector<16x128xbf16>, vector<128x128xbf16>, vector<16x128xf32> -> vector<16x128xf32>
    %32 = arith.addf %28, %31 : vector<16x128xf32>
    %33 = arith.truncf %32 : vector<16x128xf32> to vector<16x128xbf16>
    %c0_17 = arith.constant 0 : index
    %c0_18 = arith.constant 0 : index
    %34 = vector.load %arg6[%c0_17, %c0_18] : memref<16x128xbf16, #tpu.memory_space<vmem>>, vector<16x128xbf16>
    tpu.vector_store %arg6[%c0_17, %c0_18], %33 {strides = array<i32>} : memref<16x128xbf16, #tpu.memory_space<vmem>>, vector<16x128xbf16>,
    %cst_19 = arith.constant dense<0.000000e+00> : vector<128xf32>
    %35 = vector.multi_reduction <add>, %32, %cst_19 [0] : vector<16x128xf32> to vector<128xf32>
    %36 = vector.shape_cast %35 : vector<128xf32> to vector<1x128xf32>
    %37 = arith.mulf %32, %32 : vector<16x128xf32>
    %cst_20 = arith.constant dense<0.000000e+00> : vector<128xf32>
    %38 = vector.multi_reduction <add>, %37, %cst_20 [0] : vector<16x128xf32> to vector<128xf32>
    %39 = vector.shape_cast %38 : vector<128xf32> to vector<1x128xf32>
    %40 = tpu.concatenate %36, %39 in 0 : vector<1x128xf32>, vector<1x128xf32> -> vector<2x128xf32>
    %41 = vector.shape_cast %40 : vector<2x128xf32> to vector<1x2x128xf32>
    %c0_21 = arith.constant 0 : index
    %c0_22 = arith.constant 0 : index
    %c0_23 = arith.constant 0 : index
    %42 = vector.load %arg7[%c0_21, %c0_22, %c0_23] : memref<1x2x128xf32, #tpu.memory_space<vmem>>, vector<1x2x128xf32>
    tpu.vector_store %arg7[%c0_21, %c0_22, %c0_23], %41 {strides = array<i32>} : memref<1x2x128xf32, #tpu.memory_space<vmem>>, vector<1x2x128xf32>,
    return
  }
  func.func @transform_0(%arg0: i32) -> (i32, i32) {
    %c0_i32 = arith.constant 0 : i32
    %c0_i32_0 = arith.constant 0 : i32
    return %arg0, %c0_i32 : i32, i32
  }
  func.func @transform_1(%arg0: i32) -> (i32, i32) {
    %c0_i32 = arith.constant 0 : i32
    %c0_i32_0 = arith.constant 0 : i32
    %c0_i32_1 = arith.constant 0 : i32
    return %c0_i32, %c0_i32_0 : i32, i32
  }
  func.func @transform_2(%arg0: i32) -> (i32, i32) {
    %c0_i32 = arith.constant 0 : i32
    %c0_i32_0 = arith.constant 0 : i32
    %c0_i32_1 = arith.constant 0 : i32
    return %c0_i32, %c0_i32_0 : i32, i32
  }
  func.func @transform_3(%arg0: i32) -> (i32, i32) {
    %c0_i32 = arith.constant 0 : i32
    %c0_i32_0 = arith.constant 0 : i32
    %c0_i32_1 = arith.constant 0 : i32
    return %c0_i32, %c0_i32_0 : i32, i32
  }
  func.func @transform_4(%arg0: i32) -> (i32, i32, i32) {
    %c0_i32 = arith.constant 0 : i32
    %c0_i32_0 = arith.constant 0 : i32
    %c0_i32_1 = arith.constant 0 : i32
    %c0_i32_2 = arith.constant 0 : i32
    return %c0_i32, %c0_i32_0, %c0_i32_1 : i32, i32, i32
  }
  func.func @transform_5(%arg0: i32) -> (i32, i32) {
    %c0_i32 = arith.constant 0 : i32
    %c0_i32_0 = arith.constant 0 : i32
    return %arg0, %c0_i32 : i32, i32
  }
  func.func @transform_6(%arg0: i32) -> (i32, i32, i32) {
    %c0_i32 = arith.constant 0 : i32
    %c0_i32_0 = arith.constant 0 : i32
    %c0_i32_1 = arith.constant 0 : i32
    return %arg0, %c0_i32, %c0_i32_0 : i32, i32, i32
  }
}

module attributes {stable_mosaic.version = 11 : i64} {
  func.func @_bn_relu_kernel(%arg0: i32, %arg1: memref<16x128xbf16, #tpu.memory_space<vmem>>, %arg2: memref<1x128xf32, #tpu.memory_space<vmem>>, %arg3: memref<1x128xf32, #tpu.memory_space<vmem>>, %arg4: memref<16x128xf32, #tpu.memory_space<vmem>>) attributes {dimension_semantics = [#tpu.dimension_semantics<parallel>], iteration_bounds = array<i64: 2>, scalar_prefetch = 0 : i64, scratch_operands = 0 : i64, tpu.core_type = #tpu.core_type<tc>, window_params = [{transform_indices = @transform_0, window_bounds = array<i64: 16, 128>}, {pipeline_mode = #tpu.pipeline_mode<synchronous>, transform_indices = @transform_1, window_bounds = array<i64: 1, 128>}, {pipeline_mode = #tpu.pipeline_mode<synchronous>, transform_indices = @transform_2, window_bounds = array<i64: 1, 128>}, {transform_indices = @transform_3, window_bounds = array<i64: 16, 128>}]} {
    %c0 = arith.constant 0 : index
    %c0_0 = arith.constant 0 : index
    %0 = vector.load %arg1[%c0, %c0_0] : memref<16x128xbf16, #tpu.memory_space<vmem>>, vector<16x128xbf16>
    %1 = arith.extf %0 : vector<16x128xbf16> to vector<16x128xf32>
    %c0_1 = arith.constant 0 : index
    %c0_2 = arith.constant 0 : index
    %2 = vector.load %arg2[%c0_1, %c0_2] : memref<1x128xf32, #tpu.memory_space<vmem>>, vector<1x128xf32>
    %3 = vector.broadcast %2 : vector<1x128xf32> to vector<16x128xf32>
    %4 = arith.mulf %1, %3 : vector<16x128xf32>
    %c0_3 = arith.constant 0 : index
    %c0_4 = arith.constant 0 : index
    %5 = vector.load %arg3[%c0_3, %c0_4] : memref<1x128xf32, #tpu.memory_space<vmem>>, vector<1x128xf32>
    %6 = vector.broadcast %5 : vector<1x128xf32> to vector<16x128xf32>
    %7 = arith.addf %4, %6 : vector<16x128xf32>
    %cst = arith.constant 0.000000e+00 : f32
    %8 = vector.broadcast %cst : f32 to vector<16x128xf32>
    %9 = arith.maximumf %7, %8 : vector<16x128xf32>
    %c0_5 = arith.constant 0 : index
    %c0_6 = arith.constant 0 : index
    %10 = vector.load %arg4[%c0_5, %c0_6] : memref<16x128xf32, #tpu.memory_space<vmem>>, vector<16x128xf32>
    tpu.vector_store %arg4[%c0_5, %c0_6], %9 {strides = array<i32>} : memref<16x128xf32, #tpu.memory_space<vmem>>, vector<16x128xf32>,
    return
  }
  func.func @transform_0(%arg0: i32) -> (i32, i32) {
    %c0_i32 = arith.constant 0 : i32
    %c0_i32_0 = arith.constant 0 : i32
    return %arg0, %c0_i32 : i32, i32
  }
  func.func @transform_1(%arg0: i32) -> (i32, i32) {
    %c0_i32 = arith.constant 0 : i32
    %c0_i32_0 = arith.constant 0 : i32
    %c0_i32_1 = arith.constant 0 : i32
    return %c0_i32, %c0_i32_0 : i32, i32
  }
  func.func @transform_2(%arg0: i32) -> (i32, i32) {
    %c0_i32 = arith.constant 0 : i32
    %c0_i32_0 = arith.constant 0 : i32
    %c0_i32_1 = arith.constant 0 : i32
    return %c0_i32, %c0_i32_0 : i32, i32
  }
  func.func @transform_3(%arg0: i32) -> (i32, i32) {
    %c0_i32 = arith.constant 0 : i32
    %c0_i32_0 = arith.constant 0 : i32
    return %arg0, %c0_i32 : i32, i32
  }
}

</mosaic_0001>

<bundles_post_ra>
// kernel: double_conv_block.3
= control target key start
LH: loop header
LB: loop body
LE: loop exit
PB: predicated region body
PF: predicated region fallthrough
CT: control target
= control target key end

     0   :  { %s502_s15 = smov 0   ;;  %s549_s0 = inlined_call_operand.vmem [shape: f32[32,4], index: 0, kind: input, shape index: {}]   ;;  %s550_s1 = inlined_call_operand.vmem [shape: f32[16,2], index: 1, kind: input, shape index: {}]   ;;  %s551_s2 = inlined_call_operand.vmem [shape: bf16[3,4,128], index: 2, kind: input, shape index: {}]   ;;  %s552_s3 = inlined_call_operand.vmem [shape: bf16[32,128], index: 3, kind: output, shape index: {0}]   ;;  %s553_s4 = inlined_call_operand.vmem [shape: f32[2,2,128], index: 4, kind: output, shape index: {1}]  }
   0x1 LB: > { %s508_s16 = sadd.s32 4294967295, %s473_s15   ;;  %p437_p0 = scmp.ge.s32.totalorder %s473_s15, 1  ;;  %s473_s15 = sphi %s502_s15, %s15_s15  }
   0x2   : > { %p166_p1 = scmp.lt.s32.totalorder %s473_s15, 3 }
   0x4   : > { %p167_p2 = pnand %p437_p0, %p166_p1 }
   0x5   : > { %s438_s21 = sshll.u32 (!%p167_p2), %s508_s16, 1  ;;  %p208_p4 = scmp.lt.s32.totalorder (!%p167_p2), %s508_s16, 1 }
   0x6   : > { %170 = sbr.rel (%p167_p2) target bundleno = 300 (0x12c), region = 32  ;;  %p197_p3 = scmp.lt.s32.totalorder (!%p167_p2), %s438_s21, 3 }
   0xb   : > { %v215_v0 = vld [vmem:[%s550_s1] sm:$0xff]  ;;  %v475_v1 = vmov 1   ;;  %v476_v2 = vmov 0   ;;  %v216_v3 = vld [vmem:[%s550_s1 + $0x8] sm:$0xff]  ;;  %s555_s21 = smov (!%p197_p3, %s438_s21), 3  ;;  %vm261_vm0 = vcmask 1041408   ;;  %v219_v13 = vlaneseq }
   0xc   : > { %465 = vset.pattern.permute.xlu0 %v475_v1  ;;  %466 = vset.pattern.permute.xlu1 %v476_v2  ;;  %s439_s22 = sshll.u32 %s555_s21, 3  ;;  %v443_v4 = vld [vmem:[%s551_s2 + $0x2] sm:$0x3]  ;;  %vm257_vm1 = vcmask 31744   ;;  %v254_v9 = vld [vmem:[%s551_s2] sm:$0x3] }
   0xd   : > { %226 = vperm.xlu1 %466, %v215_v0   ;;  %244 = vperm.xlu0 %465, %v215_v0   ;;  %v263_v5 = vsel %vm261_vm0, %v443_v4, 0  ;;  %s200_s27 = scalar_lea.vmem %s549_s0, %s439_s22  ;;  %v446_v10 = vld [vmem:[%s551_s2 + $0x4] sm:$0x3]  ;;  %v283_v11 = vsel %vm261_vm0, %v254_v9, 0  ;;  %v220_v14 = vshrl.u32 %v219_v13, 7  ;;  %s441_s6 = sshll.u32 %s555_s21, 2 }
   0xe   : > { %272 = vmatpush.bf16.msra.mxu0 %v263_v5  ;;  %v213_v6 = vld [vmem:[%s200_s27] sm:$0xff]  ;;  %v214_v7 = vld [vmem:[%s200_s27 + $0x8] sm:$0xff]  ;;  %v305_v12 = vsel %vm261_vm0, %v446_v10, 0  ;;  %292 = vmatpush.bf16.msra.mxu1 %v283_v11  ;;  %s206_s9 = scalar_lea.vmem %s552_s3, %s441_s6  ;;  %s557_s16 = smov (!%p208_p4, %s508_s16), 1  ;;  %vm343_vm4 = vcmask 1040384  }
   0xf   : > { %v237_v8 = vpack.c.bf16 %v214_v7, %v213_v6  ;;  %314 = vmatpush.bf16.msra.mxu2 %v305_v12  ;;  %v217_v17 = vrot.slane %v213_v6, 7  ;;  %v218_v18 = vrot.slane %v214_v7, 7  ;;  %v238_v19 = vrot.slane %v213_v6, 1  ;;  %s442_s10 = sshll.u32 %s557_s16, 1 }
  0x10   : > { %v239_v20 = vrot.slane %v214_v7, 1  ;;  %vm221_vm2 = vcmp.lt.s32.totalorder %v220_v14, 1  ;;  %vm240_vm3 = vcmp.lt.s32.totalorder %v220_v14, 7  ;;  %s211_s13 = scalar_lea.vmem %s553_s4, %s442_s10 }
  0x11   : > { %444 = vmatmul.msk.bf16.vlgmr.msra.gmra.mxu0 %vm257_vm1, %v237_v8  ;;  %v223_v21 = vsel %vm221_vm2, %v218_v18, %v217_v17  ;;  %v222_v23 = vsel %vm221_vm2, %v217_v17, %v218_v18 }
  0x12   : > { %v241_v22 = vsel %vm240_vm3, %v238_v19, %v239_v20  ;;  %v242_v24 = vsel %vm240_vm3, %v239_v20, %v238_v19 }
  0x15   : > { %231 = vperm.xlu1 %466, %v216_v3   ;;  %248 = vperm.xlu0 %465, %v216_v3  }
  0x7f   : > { %v227_v15 = vpop.permute.xlu1 %226  ;;  %v245_v16 = vpop.permute.xlu0 %244 }
  0x80   : > { %v234_v27 = vmul.f32 %v227_v15, %v223_v21  ;;  %v251_v28 = vmul.f32 %v245_v16, %v241_v22 }
  0x87   : > { %v232_v25 = vpop.permute.xlu1 %231  ;;  %v249_v26 = vpop.permute.xlu0 %248 }
  0x88   : > { %v235_v29 = vmul.f32 %v232_v25, %v222_v23  ;;  %v252_v30 = vmul.f32 %v249_v26, %v242_v24 }
  0x8a   : > { %v236_v31 = vpack.c.bf16 %v235_v29, %v234_v27  ;;  %v253_v32 = vpack.c.bf16 %v252_v30, %v251_v28 }
  0x8c   : > { %445 = vmatmul.msk.bf16.vlgmr.msra.gmra.mxu1 %vm257_vm1, %v236_v31  ;;  %447 = vmatmul.msk.bf16.vlgmr.msra.gmra.mxu2 %vm257_vm1, %v253_v32 }
  0x8e   : > { %v274_v34 = vpop.f32.mrf.mxu0 }
  0x96   : > { %v276_v38 = vpop.f32.mrf.mxu0 }
 0x109   : > { %v294_v33 = vpop.f32.mrf.mxu1 }
 0x10a   : > { %v295_v37 = vadd.f32 %v294_v33, %v274_v34 }
 0x10f   : > { %v316_v35 = vpop.f32.mrf.mxu2 }
 0x110   : > { %v321_v39 = vadd.f32 %v316_v35, %v295_v37 }
 0x111   : > { %v296_v36 = vpop.f32.mrf.mxu1 }
 0x112   : > { %v297_v40 = vadd.f32 %v296_v36, %v276_v38  ;;  %v334_v43 = vmul.f32 %v321_v39, %v321_v39 }
 0x117   : > { %v318_v41 = vpop.f32.mrf.mxu2 }
 0x118   : > { %v322_v42 = vadd.f32 %v318_v41, %v297_v40 }
 0x11a   : > { %v453_v44 = vpack.c.bf16 %v322_v42, %v321_v39  ;;  %v327_v45 = vadd.f32 %v322_v42, %v321_v39  ;;  %v335_v46 = vmul.f32 %v322_v42, %v322_v42 }
 0x11c   : > { %454 = vst [vmem:[%s206_s9] sm:$0xff] %v453_v44   ;;  %v328_v47 = vrot.slane %v327_v45, 4  ;;  %v336_v48 = vadd.f32 %v335_v46, %v334_v43 }
 0x11e   : > { %v329_v49 = vadd.f32 %v328_v47, %v327_v45  ;;  %v337_v50 = vrot.slane %v336_v48, 4 }
 0x120   : > { %v330_v51 = vrot.slane %v329_v49, 2  ;;  %v338_v52 = vadd.f32 %v337_v50, %v336_v48 }
 0x122   : > { %v331_v53 = vadd.f32 %v330_v51, %v329_v49  ;;  %v339_v54 = vrot.slane %v338_v52, 2 }
 0x124   : > { %v332_v55 = vrot.slane %v331_v53, 1  ;;  %v340_v56 = vadd.f32 %v339_v54, %v338_v52 }
 0x126   : > { %v341_v57 = vrot.slane %v340_v56, 1  ;;  %v333_v58 = vadd.f32 %v332_v55, %v331_v53 }
 0x128   : > { %v342_v59 = vadd.f32 %v341_v57, %v340_v56 }
 0x12a   : > { %v344_v60 = vsel %vm343_vm4, %v333_v58, %v342_v59 }
 0x12b   : > { %345 = vst [vmem:[%s211_s13] sm:$0x3] %v344_v60 }
 0x12c PF: > { %s15_s15 = sadd.s32 1, %s473_s15  }
 0x12d   : > { %p12_p5 = scmp.ge.s32.totalorder %s15_s15, 4  }
 0x12f   :  { %14 = sbr.rel (!%p12_p5) target bundleno = 1 (0x1), region = 76 }

// kernel: double_conv_block.5
= control target key start
LH: loop header
LB: loop body
LE: loop exit
PB: predicated region body
PF: predicated region fallthrough
CT: control target
= control target key end

     0   :  { %s303_s12 = smov 0   ;;  %s326_s0 = inlined_call_operand.vmem [shape: bf16[32,128], index: 0, kind: input, shape index: {}]   ;;  %s327_s1 = inlined_call_operand.vmem [shape: f32[1,128], index: 1, kind: input, shape index: {}]   ;;  %s328_s2 = inlined_call_operand.vmem [shape: f32[1,128], index: 2, kind: input, shape index: {}]   ;;  %s329_s3 = inlined_call_operand.vmem [shape: f32[32,128], index: 3, kind: output, shape index: {}]  }
   0x1 LB: > { %s250_s13 = sadd.s32 4294967295, %s281_s12   ;;  %p254_p0 = scmp.ge.s32.totalorder %s281_s12, 1  ;;  %s281_s12 = sphi %s303_s12, %s13_s12  }
   0x2   : > { %p138_p1 = scmp.lt.s32.totalorder %s281_s12, 3 }
   0x4   : > { %p139_p2 = pnand %p254_p0, %p138_p1 }
   0x5   : > { %s255_s14 = sshll.u32 (!%p139_p2), %s250_s13, 1 }
   0x6   : > { %142 = sbr.rel (%p139_p2) target bundleno = 25 (0x19), region = 32  ;;  %p163_p3 = scmp.lt.s32.totalorder (!%p139_p2), %s255_s14, 3 }
   0xb   : > { %s331_s14 = smov (!%p163_p3, %s255_s14), 3  ;;  %v273_v0 = vld [vmem:[%s327_s1] ss:$0 sm:$0xff] }
   0xc   : > { %s256_s15 = sshll.u32 %s331_s14, 2  ;;  %v274_v4 = vld [vmem:[%s328_s2] ss:$0 sm:$0xff]  ;;  %s258_s23 = sshll.u32 %s331_s14, 3 }
   0xd   : > { %s166_s18 = scalar_lea.vmem %s326_s0, %s256_s15  ;;  %s172_s26 = scalar_lea.vmem %s329_s3, %s258_s23 }
   0xe   : > { %v262_v1 = vld [vmem:[%s166_s18] sm:$0xff]  }
   0xf   : > { %v263_v2 = vunpack.c.l.bf16 %v262_v1  ;;  %v264_v3 = vunpack.c.h.bf16 %v262_v1 }
  0x11   : > { %v182_v5 = vmul.f32 %v273_v0, %v263_v2  ;;  %v183_v6 = vmul.f32 %v273_v0, %v264_v3 }
  0x13   : > { %v188_v7 = vadd.f32 %v274_v4, %v182_v5  ;;  %v189_v8 = vadd.f32 %v274_v4, %v183_v6 }
  0x15   : > { %v190_v9 = vmax.f32 %v188_v7, 0.0  ;;  %v191_v10 = vmax.f32 %v189_v8, 0.0 }
  0x17   : > { %192 = vst [vmem:[%s172_s26] sm:$0xff] %v190_v9 }
  0x18   : > { %193 = vst [vmem:[%s172_s26 + $0x8] sm:$0xff] %v191_v10 }
  0x19 PF: > { %s13_s12 = sadd.s32 1, %s281_s12  }
  0x1a   : > { %p10_p4 = scmp.ge.s32.totalorder %s13_s12, 4  }
  0x1c   :  { %12 = sbr.rel (!%p10_p4) target bundleno = 1 (0x1), region = 62 }

// kernel: double_conv_block.4
= control target key start
LH: loop header
LB: loop body
LE: loop exit
PB: predicated region body
PF: predicated region fallthrough
CT: control target
= control target key end

     0   :  { %s903_s21 = smov 0   ;;  %s1019_s0 = inlined_call_operand.vmem [shape: bf16[32,128], index: 0, kind: input, shape index: {}]   ;;  %s1020_s1 = inlined_call_operand.vmem [shape: f32[16,2], index: 1, kind: input, shape index: {}]   ;;  %s1021_s2 = inlined_call_operand.vmem [shape: f32[1,128], index: 2, kind: input, shape index: {}]   ;;  %s1022_s3 = inlined_call_operand.vmem [shape: f32[1,128], index: 3, kind: input, shape index: {}]   ;;  %s1023_s4 = inlined_call_operand.vmem [shape: bf16[3,128,128], index: 4, kind: input, shape index: {}]   ;;  %s1024_s5 = inlined_call_operand.vmem [shape: bf16[32,128], index: 5, kind: output, shape index: {0}]   ;;  %s1025_s6 = inlined_call_operand.vmem [shape: f32[2,2,128], index: 6, kind: output, shape index: {1}]  }
   0x1 LB: > { %s909_s22 = sadd.s32 4294967295, %s864_s21   ;;  %p675_p0 = scmp.ge.s32.totalorder %s864_s21, 1  ;;  %s864_s21 = sphi %s903_s21, %s17_s21  }
   0x2   : > { %p216_p1 = scmp.lt.s32.totalorder %s864_s21, 3 }
   0x4   : > { %p217_p2 = pnand %p675_p0, %p216_p1 }
   0x5   : > { %s676_s13 = sshll.u32 (!%p217_p2), %s909_s22, 1  ;;  %p262_p4 = scmp.lt.s32.totalorder (!%p217_p2), %s909_s22, 1 }
   0x6   : > { %220 = sbr.rel (%p217_p2) target bundleno = 300 (0x12c), region = 40  ;;  %p251_p3 = scmp.lt.s32.totalorder (!%p217_p2), %s676_s13, 3 }
   0xb   : > { %v284_v0 = vld [vmem:[%s1020_s1] sm:$0xff]  ;;  %v826_v1 = vld [vmem:[%s1023_s4 + $0x78] sm:$0xff]  ;;  %v866_v2 = vmov 1   ;;  %v867_v3 = vmov 0   ;;  %v825_v6 = vld [vmem:[%s1023_s4 + $0x70] sm:$0xff]  ;;  %s1027_s13 = smov (!%p251_p3, %s676_s13), 3  ;;  %v288_v40 = vlaneseq }
   0xc   : > { %854 = vset.pattern.permute.xlu0 %v866_v2  ;;  %855 = vset.pattern.permute.xlu1 %v867_v3  ;;  %v818_v4 = vld [vmem:[%s1023_s4 + $0x38] sm:$0xff]  ;;  %v817_v7 = vld [vmem:[%s1023_s4 + $0x30] sm:$0xff]  ;;  %v285_v9 = vld [vmem:[%s1020_s1 + $0x8] sm:$0xff]  ;;  %s677_s14 = sshll.u32 %s1027_s13, 2  ;;  %s1029_s22 = smov (!%p262_p4, %s909_s22), 1  ;;  %vm581_vm2 = vcmask 1040384  }
   0xd   : > { %v834_v5 = vld [vmem:[%s1023_s4 + $0xb8] sm:$0xff]  ;;  %295 = vperm.xlu1 %855, %v284_v0   ;;  %313 = vperm.xlu0 %854, %v284_v0   ;;  %v833_v8 = vld [vmem:[%s1023_s4 + $0xb0] sm:$0xff]  ;;  %v824_v10 = vld [vmem:[%s1023_s4 + $0x68] sm:$0xff]  ;;  %s254_s17 = scalar_lea.vmem %s1019_s0, %s677_s14  ;;  %v289_v41 = vshrl.u32 %v288_v40, 7  ;;  %s260_s20 = scalar_lea.vmem %s1024_s5, %s677_s14 }
   0xe   : > { %404 = vmatpush.bf16.msra.mxu0 %v826_v1  ;;  %466 = vmatpush.bf16.msra.mxu1 %v818_v4  ;;  %v816_v11 = vld [vmem:[%s1023_s4 + $0x28] sm:$0xff]  ;;  %v823_v13 = vld [vmem:[%s1023_s4 + $0x60] sm:$0xff]  ;;  %v822_v16 = vld [vmem:[%s1023_s4 + $0x58] sm:$0xff]  ;;  %s680_s13 = sshll.u32 %s1029_s22, 1 }
   0xf   : > { %545 = vmatpush.bf16.msra.mxu2 %v834_v5  ;;  %v832_v12 = vld [vmem:[%s1023_s4 + $0xa8] sm:$0xff]  ;;  %v815_v14 = vld [vmem:[%s1023_s4 + $0x20] sm:$0xff]  ;;  %v814_v17 = vld [vmem:[%s1023_s4 + $0x18] sm:$0xff]  ;;  %vm290_vm0 = vcmp.lt.s32.totalorder %v289_v41, 1  ;;  %vm309_vm1 = vcmp.lt.s32.totalorder %v289_v41, 7  ;;  %s265_s24 = scalar_lea.vmem %s1025_s6, %s680_s13 }
  0x10   : > { %v831_v15 = vld [vmem:[%s1023_s4 + $0xa0] sm:$0xff]  ;;  %v830_v18 = vld [vmem:[%s1023_s4 + $0x98] sm:$0xff]  ;;  %v821_v19 = vld [vmem:[%s1023_s4 + $0x50] sm:$0xff] }
  0x11   : > { %v836_v20 = vld [vmem:[%s254_s17] sm:$0xff]   ;;  %v820_v27 = vld [vmem:[%s1023_s4 + $0x48] sm:$0xff]  ;;  %v813_v28 = vld [vmem:[%s1023_s4 + $0x10] sm:$0xff] }
  0x12   : > { %405 = vmatpush.bf16.msra.mxu0 %v825_v6  ;;  %467 = vmatpush.bf16.msra.mxu1 %v817_v7  ;;  %v837_v21 = vunpack.c.l.bf16 %v836_v20  ;;  %v838_v22 = vunpack.c.h.bf16 %v836_v20  ;;  %v856_v23 = vld [vmem:[%s1021_s2] ss:$0 sm:$0xff]  ;;  %v829_v29 = vld [vmem:[%s1023_s4 + $0x90] sm:$0xff]  ;;  %v812_v33 = vld [vmem:[%s1023_s4 + $0x8] sm:$0xff] }
  0x13   : > { %546 = vmatpush.bf16.msra.mxu2 %v833_v8  ;;  %v857_v26 = vld [vmem:[%s1022_s3] ss:$0 sm:$0xff]  ;;  %v828_v34 = vld [vmem:[%s1023_s4 + $0x88] sm:$0xff] }
  0x14   : > { %v274_v24 = vmul.f32 %v856_v23, %v837_v21  ;;  %v275_v25 = vmul.f32 %v856_v23, %v838_v22  ;;  %v819_v32 = vld [vmem:[%s1023_s4 + $0x40] sm:$0xff] }
  0x15   : > { %300 = vperm.xlu1 %855, %v285_v9   ;;  %317 = vperm.xlu0 %854, %v285_v9   ;;  %v811_v38 = vld [vmem:[%s1023_s4] sm:$0xff] }
  0x16   : > { %406 = vmatpush.bf16.msra.mxu0 %v824_v10  ;;  %468 = vmatpush.bf16.msra.mxu1 %v816_v11  ;;  %v280_v30 = vadd.f32 %v857_v26, %v274_v24  ;;  %v281_v31 = vadd.f32 %v857_v26, %v275_v25  ;;  %v827_v39 = vld [vmem:[%s1023_s4 + $0x80] sm:$0xff] }
  0x17   : > { %547 = vmatpush.bf16.msra.mxu2 %v832_v12 }
  0x18   : > { %v282_v35 = vmax.f32 %v280_v30, 0.0  ;;  %v283_v36 = vmax.f32 %v281_v31, 0.0 }
  0x1a   : > { %407 = vmatpush.bf16.msra.mxu0 %v823_v13  ;;  %469 = vmatpush.bf16.msra.mxu1 %v815_v14  ;;  %v306_v37 = vpack.c.bf16 %v283_v36, %v282_v35  ;;  %v286_v44 = vrot.slane %v282_v35, 7  ;;  %v287_v45 = vrot.slane %v283_v36, 7  ;;  %v307_v46 = vrot.slane %v282_v35, 1 }
  0x1b   : > { %548 = vmatpush.bf16.msra.mxu2 %v831_v15  ;;  %v308_v47 = vrot.slane %v283_v36, 1 }
  0x1c   : > { %v292_v48 = vsel %vm290_vm0, %v287_v45, %v286_v44  ;;  %v291_v50 = vsel %vm290_vm0, %v286_v44, %v287_v45 }
  0x1d   : > { %v310_v49 = vsel %vm309_vm1, %v307_v46, %v308_v47  ;;  %v311_v51 = vsel %vm309_vm1, %v308_v47, %v307_v46 }
  0x1e   : > { %408 = vmatpush.bf16.msra.mxu0 %v822_v16  ;;  %470 = vmatpush.bf16.msra.mxu1 %v814_v17 }
  0x1f   : > { %549 = vmatpush.bf16.msra.mxu2 %v830_v18 }
  0x22   : > { %409 = vmatpush.bf16.msra.mxu0 %v821_v19  ;;  %471 = vmatpush.bf16.msra.mxu1 %v813_v28 }
  0x23   : > { %550 = vmatpush.bf16.msra.mxu2 %v829_v29 }
  0x26   : > { %410 = vmatpush.bf16.msra.mxu0 %v820_v27  ;;  %472 = vmatpush.bf16.msra.mxu1 %v812_v33 }
  0x27   : > { %551 = vmatpush.bf16.msra.mxu2 %v828_v34 }
  0x2a   : > { %411 = vmatpush.bf16.msra.mxu0 %v819_v32  ;;  %473 = vmatpush.bf16.msra.mxu1 %v811_v38 }
  0x2b   : > { %552 = vmatpush.bf16.msra.mxu2 %v827_v39 }
  0x2d   : > { %412 = vmatmul.bf16.vlgmr.msra.gmra.mxu0 %v306_v37 }
  0x7f   : > { %v296_v42 = vpop.permute.xlu1 %295  ;;  %v314_v43 = vpop.permute.xlu0 %313 }
  0x80   : > { %v303_v54 = vmul.f32 %v296_v42, %v292_v48  ;;  %v320_v55 = vmul.f32 %v314_v43, %v310_v49 }
  0x87   : > { %v301_v52 = vpop.permute.xlu1 %300  ;;  %v318_v53 = vpop.permute.xlu0 %317 }
  0x88   : > { %v304_v56 = vmul.f32 %v301_v52, %v291_v50  ;;  %v321_v57 = vmul.f32 %v318_v53, %v311_v51 }
  0x8a   : > { %v305_v58 = vpack.c.bf16 %v304_v56, %v303_v54  ;;  %v322_v59 = vpack.c.bf16 %v321_v57, %v320_v55 }
  0x8c   : > { %474 = vmatmul.bf16.vlgmr.msra.gmra.mxu1 %v305_v58  ;;  %553 = vmatmul.bf16.vlgmr.msra.gmra.mxu2 %v322_v59 }
  0xaa   : > { %v413_v61 = vpop.f32.mrf.mxu0 }
  0xb2   : > { %v415_v1 = vpop.f32.mrf.mxu0 }
 0x109   : > { %v475_v60 = vpop.f32.mrf.mxu1 }
 0x10a   : > { %v476_v0 = vadd.f32 %v475_v60, %v413_v61 }
 0x10f   : > { %v554_v62 = vpop.f32.mrf.mxu2 }
 0x110   : > { %v559_v2 = vadd.f32 %v554_v62, %v476_v0 }
 0x111   : > { %v477_v63 = vpop.f32.mrf.mxu1 }
 0x112   : > { %v478_v3 = vadd.f32 %v477_v63, %v415_v1  ;;  %v572_v6 = vmul.f32 %v559_v2, %v559_v2 }
 0x117   : > { %v556_v4 = vpop.f32.mrf.mxu2 }
 0x118   : > { %v560_v5 = vadd.f32 %v556_v4, %v478_v3 }
 0x11a   : > { %v842_v7 = vpack.c.bf16 %v560_v5, %v559_v2  ;;  %v565_v8 = vadd.f32 %v560_v5, %v559_v2  ;;  %v573_v9 = vmul.f32 %v560_v5, %v560_v5 }
 0x11c   : > { %843 = vst [vmem:[%s260_s20] sm:$0xff] %v842_v7   ;;  %v566_v10 = vrot.slane %v565_v8, 4  ;;  %v574_v11 = vadd.f32 %v573_v9, %v572_v6 }
 0x11e   : > { %v567_v12 = vadd.f32 %v566_v10, %v565_v8  ;;  %v575_v13 = vrot.slane %v574_v11, 4 }
 0x120   : > { %v568_v14 = vrot.slane %v567_v12, 2  ;;  %v576_v15 = vadd.f32 %v575_v13, %v574_v11 }
 0x122   : > { %v569_v16 = vadd.f32 %v568_v14, %v567_v12  ;;  %v577_v17 = vrot.slane %v576_v15, 2 }
 0x124   : > { %v570_v18 = vrot.slane %v569_v16, 1  ;;  %v578_v19 = vadd.f32 %v577_v17, %v576_v15 }
 0x126   : > { %v579_v20 = vrot.slane %v578_v19, 1  ;;  %v571_v21 = vadd.f32 %v570_v18, %v569_v16 }
 0x128   : > { %v580_v22 = vadd.f32 %v579_v20, %v578_v19 }
 0x12a   : > { %v582_v23 = vsel %vm581_vm2, %v571_v21, %v580_v22 }
 0x12b   : > { %583 = vst [vmem:[%s265_s24] sm:$0x3] %v582_v23 }
 0x12c PF: > { %s17_s21 = sadd.s32 1, %s864_s21  }
 0x12d   : > { %p14_p5 = scmp.ge.s32.totalorder %s17_s21, 4  }
 0x12f   :  { %16 = sbr.rel (!%p14_p5) target bundleno = 1 (0x1), region = 84 }

</bundles_post_ra>
